<compile_context>
chip_gen: v7x
topology: tpu7x:2x2x1
jax: 0.10.0
libtpu: 0.0.40
codegen_flags: <defaults>
</compile_context>

<pallas_src>
import jax
import jax.numpy as jnp
from jax.experimental import pallas as pl
from jax.experimental.pallas import tpu as pltpu

# ---- model hyper-params (small, deterministic) ----
BATCH = 2
SEQ = 8
EMBED = 32
NUM_HEADS = 4
HEAD_DIM = EMBED // NUM_HEADS
SCALING = HEAD_DIM ** (-0.5)


def _attn_kernel(h_ref, mask_ref, wqkv_ref, bqkv_ref, wo_ref, bo_ref, out_ref):
    """Single invocation, whole batch.

    h_ref    : (B*T, E)      f32  flattened hidden states
    mask_ref : (H*B, T, T)   f32  additive mask, pre-broadcast over heads
    wqkv_ref : (E, 3E)       f32  pre-transposed fused QKV weight (Q scaled)
    bqkv_ref : (1, 3E)       f32  fused QKV bias (Q part scaled)
    wo_ref   : (E, E)        f32  pre-transposed output-proj weight
    bo_ref   : (1, E)        f32  output-proj bias
    out_ref  : (B*T, E)      f32
    """
    N = BATCH * SEQ

    h = h_ref[...]                                       # (N, E)

    # One fused QKV projection on the MXU, f32 accumulation.
    qkv = jnp.dot(h, wqkv_ref[...], preferred_element_type=jnp.float32)
    qkv = qkv + bqkv_ref[...]                            # (N, 3E)

    # Head-batched relayout: move the lane-split head dim to a leading batch
    # dim (n = h*B + b) using static slices + a leading-dim concat only.
    def to_heads(base):
        parts = [
            qkv[:, base + hd * HEAD_DIM: base + (hd + 1) * HEAD_DIM]
            .reshape(BATCH, SEQ, HEAD_DIM)
            for hd in range(NUM_HEADS)
        ]
        return jnp.concatenate(parts, axis=0)            # (H*B, T, Dh)

    q = to_heads(0)
    k = to_heads(EMBED)
    v = to_heads(2 * EMBED)

    # One scores einsum, one softmax, one PV einsum over the fused (H*B) batch.
    scores = jnp.einsum("nqd,nkd->nqk", q, k,
                        preferred_element_type=jnp.float32) + mask_ref[...]
    m = jnp.max(scores, axis=-1, keepdims=True)
    p = jnp.exp(scores - m)
    l = jnp.sum(p, axis=-1, keepdims=True)

    ctx = jnp.einsum("nqk,nkd->nqd", p, v,
                     preferred_element_type=jnp.float32)
    ctx = ctx * pl.reciprocal(l, approx=True)            # EUP slot (free-ish)

    # (H*B, T, Dh) -> (N, E): cheap major-dim slices + one lane concat, then a
    # SINGLE fused output-projection matmul (one MXU push / one MRF drain).
    ctx_full = jnp.concatenate(
        [ctx[hd * BATCH:(hd + 1) * BATCH].reshape(N, HEAD_DIM)
         for hd in range(NUM_HEADS)],
        axis=1)                                          # (N, E)

    out_ref[...] = (jnp.dot(ctx_full, wo_ref[...],
                            preferred_element_type=jnp.float32)
                    + bo_ref[...])


def pack_params(params):
    """One-time host-side transform of PyTorch-convention params.

    Returns (wqkv [E,3E], bqkv [1,3E], wo_t [E,E], bo [1,E]) — all f32 — with
    weights pre-transposed to [in, out] and the attention scaling folded into
    the Q weight/bias.
    """
    wq, bq, wk, bk, wv, bv, wo, bo = params
    wqkv = jnp.concatenate([(wq * SCALING).T, wk.T, wv.T], axis=1)
    bqkv = jnp.concatenate([bq * SCALING, bk, bv], axis=1)
    return (wqkv.astype(jnp.float32),
            bqkv.astype(jnp.float32),
            wo.T.astype(jnp.float32),
            bo.astype(jnp.float32))


@jax.jit
def mvp_attention(hidden_states, attention_mask, packed_params):
    """hidden_states: [B, T, E] f32; attention_mask: [B, 1, T, T] f32 (additive)."""
    B, T, E = hidden_states.shape
    wqkv, bqkv, wo_t, bo = packed_params

    h2d = hidden_states.reshape(B * T, E).astype(jnp.float32)

    # Head-uniform additive mask, pre-broadcast (in XLA) to the fused (H*B)
    # batch dim used inside the kernel (n = h*B + b).
    mask3 = attention_mask.reshape(B, T, T).astype(jnp.float32)
    mask_hb = jnp.broadcast_to(mask3[None], (NUM_HEADS, B, T, T)).reshape(
        NUM_HEADS * B, T, T)

    vmem = pltpu.MemorySpace.VMEM
    out2d = pl.pallas_call(
        _attn_kernel,
        out_shape=jax.ShapeDtypeStruct((B * T, E), jnp.float32),
        in_specs=[
            pl.BlockSpec(memory_space=vmem),   # hidden (flat)
            pl.BlockSpec(memory_space=vmem),   # additive mask (head-batched)
            pl.BlockSpec(memory_space=vmem),   # fused QKV weight
            pl.BlockSpec(memory_space=vmem),   # fused QKV bias
            pl.BlockSpec(memory_space=vmem),   # out-proj weight
            pl.BlockSpec(memory_space=vmem),   # out-proj bias
        ],
        out_specs=pl.BlockSpec(memory_space=vmem),
    )(h2d, mask_hb, wqkv, bqkv, wo_t, bo)

    return out2d.reshape(B, T, E)


def reference_attention(hidden_states, attention_mask, params):
    """Plain-JAX f32 reference matching the PyTorch forward (self-attn, no cache)."""
    B, T, E = hidden_states.shape
    wq, bq, wk, bk, wv, bv, wo, bo = params
    q = (hidden_states @ wq.T + bq) * SCALING
    k = hidden_states @ wk.T + bk
    v = hidden_states @ wv.T + bv

    def split(x):  # [B,T,E] -> [B,H,T,Dh]
        return x.reshape(B, T, NUM_HEADS, HEAD_DIM).transpose(0, 2, 1, 3)

    qh, kh, vh = split(q), split(k), split(v)
    scores = jnp.einsum("bhqd,bhkd->bhqk", qh, kh) + attention_mask
    probs = jax.nn.softmax(scores, axis=-1)
    out = jnp.einsum("bhqk,bhkd->bhqd", probs, vh)
    out = out.transpose(0, 2, 1, 3).reshape(B, T, E)
    return out @ wo.T + bo


def make_params(key):
    ks = jax.random.split(key, 8)
    scale = 0.02
    wq = scale * jax.random.normal(ks[0], (EMBED, EMBED), jnp.float32)
    wk = scale * jax.random.normal(ks[1], (EMBED, EMBED), jnp.float32)
    wv = scale * jax.random.normal(ks[2], (EMBED, EMBED), jnp.float32)
    wo = scale * jax.random.normal(ks[3], (EMBED, EMBED), jnp.float32)
    bq = scale * jax.random.normal(ks[4], (1, EMBED), jnp.float32)
    bk = scale * jax.random.normal(ks[5], (1, EMBED), jnp.float32)
    bv = scale * jax.random.normal(ks[6], (1, EMBED), jnp.float32)
    bo = scale * jax.random.normal(ks[7], (1, EMBED), jnp.float32)
    return (wq, bq, wk, bk, wv, bv, wo, bo)


if __name__ == "__main__":
    key = jax.random.PRNGKey(0)
    k_h, k_m, k_p = jax.random.split(key, 3)

    hidden = jax.random.normal(k_h, (BATCH, SEQ, EMBED), jnp.float32)

    # causal additive mask [B, 1, T, T] (0 where allowed, -1e9 where masked)
    causal = jnp.tril(jnp.ones((SEQ, SEQ), jnp.float32))
    mask = jnp.where(causal[None, None] > 0, 0.0, -1e9).astype(jnp.float32)
    mask = jnp.broadcast_to(mask, (BATCH, 1, SEQ, SEQ))

    params = make_params(k_p)
    packed = pack_params(params)          # one-time host transform

    out = mvp_attention(hidden, mask, packed)
    out = jax.block_until_ready(out)

    ref = reference_attention(hidden, mask, params)
    assert out.shape == (BATCH, SEQ, EMBED)
    assert jnp.allclose(out, ref, rtol=2e-2, atol=2e-2), "mismatch vs reference"

    print("KERNEL_OK")
</pallas_src>

<mosaic_0001>
module attributes {stable_mosaic.version = 11 : i64} {
  func.func @_attn_kernel(%arg0: memref<16x32xf32, #tpu.memory_space<vmem>>, %arg1: memref<8x8x8xf32, #tpu.memory_space<vmem>>, %arg2: memref<32x96xf32, #tpu.memory_space<vmem>>, %arg3: memref<1x96xf32, #tpu.memory_space<vmem>>, %arg4: memref<32x32xf32, #tpu.memory_space<vmem>>, %arg5: memref<1x32xf32, #tpu.memory_space<vmem>>, %arg6: memref<16x32xf32, #tpu.memory_space<vmem>>) attributes {dimension_semantics = [], scalar_prefetch = 0 : i64, scratch_operands = 0 : i64, tpu.core_type = #tpu.core_type<tc>} {
    %c0 = arith.constant 0 : index
    %c0_0 = arith.constant 0 : index
    %0 = vector.load %arg0[%c0, %c0_0] : memref<16x32xf32, #tpu.memory_space<vmem>>, vector<16x32xf32>
    %c0_1 = arith.constant 0 : index
    %c0_2 = arith.constant 0 : index
    %1 = vector.load %arg2[%c0_1, %c0_2] : memref<32x96xf32, #tpu.memory_space<vmem>>, vector<32x96xf32>
    %cst = arith.constant dense<0.000000e+00> : vector<16x96xf32>
    %2 = tpu.matmul %0, %1, %cst {dimension_numbers = #tpu.dot_dimension_numbers<[1], [0], [0], [1], [0, 0, 1, 1], [], []>} : vector<16x32xf32>, vector<32x96xf32>, vector<16x96xf32> -> vector<16x96xf32>
    %c0_3 = arith.constant 0 : index
    %c0_4 = arith.constant 0 : index
    %3 = vector.load %arg3[%c0_3, %c0_4] : memref<1x96xf32, #tpu.memory_space<vmem>>, vector<1x96xf32>
    %4 = vector.broadcast %3 : vector<1x96xf32> to vector<16x96xf32>
    %5 = arith.addf %2, %4 : vector<16x96xf32>
    %6 = vector.extract_strided_slice %5 {offsets = [0, 0], sizes = [16, 8], strides = [1, 1]} : vector<16x96xf32> to vector<16x8xf32>
    %7 = vector.shape_cast %6 : vector<16x8xf32> to vector<2x8x8xf32>
    %8 = vector.extract_strided_slice %5 {offsets = [0, 8], sizes = [16, 8], strides = [1, 1]} : vector<16x96xf32> to vector<16x8xf32>
    %9 = vector.shape_cast %8 : vector<16x8xf32> to vector<2x8x8xf32>
    %10 = vector.extract_strided_slice %5 {offsets = [0, 16], sizes = [16, 8], strides = [1, 1]} : vector<16x96xf32> to vector<16x8xf32>
    %11 = vector.shape_cast %10 : vector<16x8xf32> to vector<2x8x8xf32>
    %12 = vector.extract_strided_slice %5 {offsets = [0, 24], sizes = [16, 8], strides = [1, 1]} : vector<16x96xf32> to vector<16x8xf32>
    %13 = vector.shape_cast %12 : vector<16x8xf32> to vector<2x8x8xf32>
    %14 = tpu.concatenate %7, %9, %11, %13 in 0 : vector<2x8x8xf32>, vector<2x8x8xf32>, vector<2x8x8xf32>, vector<2x8x8xf32> -> vector<8x8x8xf32>
    %15 = vector.extract_strided_slice %5 {offsets = [0, 32], sizes = [16, 8], strides = [1, 1]} : vector<16x96xf32> to vector<16x8xf32>
    %16 = vector.shape_cast %15 : vector<16x8xf32> to vector<2x8x8xf32>
    %17 = vector.extract_strided_slice %5 {offsets = [0, 40], sizes = [16, 8], strides = [1, 1]} : vector<16x96xf32> to vector<16x8xf32>
    %18 = vector.shape_cast %17 : vector<16x8xf32> to vector<2x8x8xf32>
    %19 = vector.extract_strided_slice %5 {offsets = [0, 48], sizes = [16, 8], strides = [1, 1]} : vector<16x96xf32> to vector<16x8xf32>
    %20 = vector.shape_cast %19 : vector<16x8xf32> to vector<2x8x8xf32>
    %21 = vector.extract_strided_slice %5 {offsets = [0, 56], sizes = [16, 8], strides = [1, 1]} : vector<16x96xf32> to vector<16x8xf32>
    %22 = vector.shape_cast %21 : vector<16x8xf32> to vector<2x8x8xf32>
    %23 = tpu.concatenate %16, %18, %20, %22 in 0 : vector<2x8x8xf32>, vector<2x8x8xf32>, vector<2x8x8xf32>, vector<2x8x8xf32> -> vector<8x8x8xf32>
    %24 = vector.extract_strided_slice %5 {offsets = [0, 64], sizes = [16, 8], strides = [1, 1]} : vector<16x96xf32> to vector<16x8xf32>
    %25 = vector.shape_cast %24 : vector<16x8xf32> to vector<2x8x8xf32>
    %26 = vector.extract_strided_slice %5 {offsets = [0, 72], sizes = [16, 8], strides = [1, 1]} : vector<16x96xf32> to vector<16x8xf32>
    %27 = vector.shape_cast %26 : vector<16x8xf32> to vector<2x8x8xf32>
    %28 = vector.extract_strided_slice %5 {offsets = [0, 80], sizes = [16, 8], strides = [1, 1]} : vector<16x96xf32> to vector<16x8xf32>
    %29 = vector.shape_cast %28 : vector<16x8xf32> to vector<2x8x8xf32>
    %30 = vector.extract_strided_slice %5 {offsets = [0, 88], sizes = [16, 8], strides = [1, 1]} : vector<16x96xf32> to vector<16x8xf32>
    %31 = vector.shape_cast %30 : vector<16x8xf32> to vector<2x8x8xf32>
    %32 = tpu.concatenate %25, %27, %29, %31 in 0 : vector<2x8x8xf32>, vector<2x8x8xf32>, vector<2x8x8xf32>, vector<2x8x8xf32> -> vector<8x8x8xf32>
    "tpu.trace_start"() <{level = 10 : i32, message = "nqd,nkd->nqk"}> : () -> ()
    %cst_5 = arith.constant dense<0.000000e+00> : vector<8x8x8xf32>
    %33 = tpu.matmul %14, %23, %cst_5 {dimension_numbers = #tpu.dot_dimension_numbers<[2], [2], [1], [1], [0, 0, 0, 1, 1, 1], [0], [0]>} : vector<8x8x8xf32>, vector<8x8x8xf32>, vector<8x8x8xf32> -> vector<8x8x8xf32>
    "tpu.trace_stop"() : () -> ()
    %c0_6 = arith.constant 0 : index
    %c0_7 = arith.constant 0 : index
    %c0_8 = arith.constant 0 : index
    %34 = vector.load %arg1[%c0_6, %c0_7, %c0_8] : memref<8x8x8xf32, #tpu.memory_space<vmem>>, vector<8x8x8xf32>
    %35 = arith.addf %33, %34 : vector<8x8x8xf32>
    %cst_9 = arith.constant dense<0xFF800000> : vector<8x8xf32>
    %36 = vector.multi_reduction <maximumf>, %35, %cst_9 [2] : vector<8x8x8xf32> to vector<8x8xf32>
    %37 = vector.shape_cast %36 : vector<8x8xf32> to vector<8x8x1xf32>
    %38 = vector.broadcast %37 : vector<8x8x1xf32> to vector<8x8x8xf32>
    %39 = arith.subf %35, %38 : vector<8x8x8xf32>
    %40 = math.exp %39 : vector<8x8x8xf32>
    %cst_10 = arith.constant dense<0.000000e+00> : vector<8x8xf32>
    %41 = vector.multi_reduction <add>, %40, %cst_10 [2] : vector<8x8x8xf32> to vector<8x8xf32>
    %42 = vector.shape_cast %41 : vector<8x8xf32> to vector<8x8x1xf32>
    "tpu.trace_start"() <{level = 10 : i32, message = "nqk,nkd->nqd"}> : () -> ()
    %cst_11 = arith.constant dense<0.000000e+00> : vector<8x8x8xf32>
    %43 = tpu.matmul %40, %32, %cst_11 {dimension_numbers = #tpu.dot_dimension_numbers<[2], [1], [1], [2], [0, 0, 0, 1, 1, 2], [0], [0]>} : vector<8x8x8xf32>, vector<8x8x8xf32>, vector<8x8x8xf32> -> vector<8x8x8xf32>
    "tpu.trace_stop"() : () -> ()
    %44 = tpu.reciprocal %42 {approx = true} : vector<8x8x1xf32> -> vector<8x8x1xf32>
    %45 = vector.broadcast %44 : vector<8x8x1xf32> to vector<8x8x8xf32>
    %46 = arith.mulf %43, %45 : vector<8x8x8xf32>
    %47 = vector.extract_strided_slice %46 {offsets = [0, 0, 0], sizes = [2, 8, 8], strides = [1, 1, 1]} : vector<8x8x8xf32> to vector<2x8x8xf32>
    %48 = vector.shape_cast %47 : vector<2x8x8xf32> to vector<16x8xf32>
    %49 = vector.extract_strided_slice %46 {offsets = [2, 0, 0], sizes = [2, 8, 8], strides = [1, 1, 1]} : vector<8x8x8xf32> to vector<2x8x8xf32>
    %50 = vector.shape_cast %49 : vector<2x8x8xf32> to vector<16x8xf32>
    %51 = vector.extract_strided_slice %46 {offsets = [4, 0, 0], sizes = [2, 8, 8], strides = [1, 1, 1]} : vector<8x8x8xf32> to vector<2x8x8xf32>
    %52 = vector.shape_cast %51 : vector<2x8x8xf32> to vector<16x8xf32>
    %53 = vector.extract_strided_slice %46 {offsets = [6, 0, 0], sizes = [2, 8, 8], strides = [1, 1, 1]} : vector<8x8x8xf32> to vector<2x8x8xf32>
    %54 = vector.shape_cast %53 : vector<2x8x8xf32> to vector<16x8xf32>
    %55 = tpu.concatenate %48, %50, %52, %54 in 1 : vector<16x8xf32>, vector<16x8xf32>, vector<16x8xf32>, vector<16x8xf32> -> vector<16x32xf32>
    %c0_12 = arith.constant 0 : index
    %c0_13 = arith.constant 0 : index
    %56 = vector.load %arg4[%c0_12, %c0_13] : memref<32x32xf32, #tpu.memory_space<vmem>>, vector<32x32xf32>
    %cst_14 = arith.constant dense<0.000000e+00> : vector<16x32xf32>
    %57 = tpu.matmul %55, %56, %cst_14 {dimension_numbers = #tpu.dot_dimension_numbers<[1], [0], [0], [1], [0, 0, 1, 1], [], []>} : vector<16x32xf32>, vector<32x32xf32>, vector<16x32xf32> -> vector<16x32xf32>
    %c0_15 = arith.constant 0 : index
    %c0_16 = arith.constant 0 : index
    %58 = vector.load %arg5[%c0_15, %c0_16] : memref<1x32xf32, #tpu.memory_space<vmem>>, vector<1x32xf32>
    %59 = vector.broadcast %58 : vector<1x32xf32> to vector<16x32xf32>
    %60 = arith.addf %57, %59 : vector<16x32xf32>
    %c0_17 = arith.constant 0 : index
    %c0_18 = arith.constant 0 : index
    %61 = vector.load %arg6[%c0_17, %c0_18] : memref<16x32xf32, #tpu.memory_space<vmem>>, vector<16x32xf32>
    tpu.vector_store %arg6[%c0_17, %c0_18], %60 {strides = array<i32>} : memref<16x32xf32, #tpu.memory_space<vmem>>, vector<16x32xf32>,
    return
  }
}

</mosaic_0001>

<bundles_post_ra>
// kernel: mvp_attention.1
= control target key start
LH: loop header
LB: loop body
LE: loop exit
PB: predicated region body
PF: predicated region fallthrough
CT: control target
= control target key end

     0   :  { %vm37_vm0 = vcmask 261120   ;;  %s2098_s0 = inlined_call_operand.vmem [shape: f32[16,32], index: 0, kind: input, shape index: {}]   ;;  %s2099_s1 = inlined_call_operand.vmem [shape: f32[8,8,8], index: 1, kind: input, shape index: {}]   ;;  %s2100_s2 = inlined_call_operand.vmem [shape: f32[32,96], index: 2, kind: input, shape index: {}]   ;;  %s2101_s3 = inlined_call_operand.vmem [shape: f32[1,96], index: 3, kind: input, shape index: {}]   ;;  %s2102_s4 = inlined_call_operand.vmem [shape: f32[32,32], index: 4, kind: input, shape index: {}]   ;;  %s2103_s5 = inlined_call_operand.vmem [shape: f32[1,32], index: 5, kind: input, shape index: {}]   ;;  %s2104_s6 = inlined_call_operand.hbm [shape: f32[16,32], index: 6, kind: output, shape index: {}]  }
   0x1   :  { %v26_v0 = vld [vmem:[%s2100_s2] sm:$0xff]  ;;  %v27_v1 = vld [vmem:[%s2100_s2 + $0x8] sm:$0xff]  ;;  %v28_v2 = vld [vmem:[%s2100_s2 + $0x10] sm:$0xff] }
   0x2   :  { %v1764_v3 = vpack.c.bf16 %v27_v1, %v26_v0  ;;  %v29_v4 = vld [vmem:[%s2100_s2 + $0x18] sm:$0xff]  ;;  %v24_v5 = vld [vmem:[%s2098_s0] sm:$0xff] }
   0x3   :  { %v1768_v6 = vpack.c.bf16 %v29_v4, %v28_v2  ;;  %1670 = vmatprep.mubr.msk.f32.mxu0 %vm37_vm0, %v24_v5 }
   0x4   :  { %11 = vsyncpa [#allocation3], 0  ;;  %1765 = vmatprep.subr.bf16.mxu0 %v1764_v3  ;;  %v25_v7 = vld [vmem:[%s2098_s0 + $0x8] sm:$0xff]  ;;  %v1588_v8 = vld [vmem:[%s2101_s3] ss:$0 sm:$0xff]  ;;  %v1848_v10 = vmov 0.0  }
   0x5   :  { %1767 = vmatpush3.bf16.msra.mxu0 %v1764_v3  ;;  %1673 = vmatprep.subr.mxu1 %v1848_v10  ;;  %s1849_s10 = smov 112   ;;  %s1850_s11 = smov 120   ;;  %vm1851_vm1 = vmmov 0   ;;  %vm143_vm2 = vcmask 64512   ;;  %v133_v30 = vld [vmem:[%s2099_s1] sm:$0xff]  ;;  %v134_v34 = vld [vmem:[%s2099_s1 + $0x8] sm:$0xff] }
   0x6   :  { %1769 = vmatprep.subr.bf16.mxu0 %v1768_v6  ;;  %1675 = vmatprep.mubr.msk.f32.mxu1 %vm1851_vm1, %v1848_v10  ;;  %s1852_s0 = smov 104   ;;  %s1853_s3 = smov 96   ;;  %v135_v40 = vld [vmem:[%s2099_s1 + $0x10] sm:$0xff]  ;;  %v136_v44 = vld [vmem:[%s2099_s1 + $0x18] sm:$0xff]  ;;  %v137_v45 = vld [vmem:[%s2099_s1 + $0x20] sm:$0xff]  ;;  %vm1472_vm3 = vcmask 130048  }
   0x7   :  { %s1854_s12 = smov 64   ;;  %v138_v53 = vld [vmem:[%s2099_s1 + $0x28] sm:$0xff]  ;;  %v139_v54 = vld [vmem:[%s2099_s1 + $0x30] sm:$0xff]  ;;  %v140_v63 = vld [vmem:[%s2099_s1 + $0x38] sm:$0xff]  ;;  %vm1475_vm4 = vcmask 195584   ;;  %s1858_s13 = smov [#allocation2]  }
   0x8   :  { %s1577_s14 = sshll.u32 %s1858_s13, 4  ;;  %s1578_s14 = int_to_ptr.vmem [resolvable:$true] %s1577_s14 }
   0x9   :  { %1771 = vmatpush3.bf16.msra.mxu0 %v1768_v6  ;;  %s1824_s15 = scalar_lea.vmem %s1578_s14, 256  ;;  %p1829_p1 = scmp.lt.s32.totalorder %s1578_s14, %s1578_s14 }
   0xa   :  { %1693 = vmatprep.subr.mxu0 %v1848_v10  ;;  %p1825_p0 = scmp.ne.s32.totalorder %s1578_s14, %s1824_s15  ;;  %p1830_p2 = scmp.lt.s32.totalorder %s1824_s15, %s1824_s15 }
   0xc   :  { %1671 = vmatmul.mubr.msk.f32.vlgmr.msra.gmra.mrb[0].mxu0 %vm37_vm0, %v25_v7  ;;  %p1831_p3 = por %p1830_p2, %p1829_p1 }
   0xd   :  { %1695 = vmatprep.mubr.msk.f32.mxu0 %vm1851_vm1, %v1848_v10 }
   0xe   :  { %p1832_p4 = pnand %p1831_p3, %p1825_p0 }
  0xdf   :  { %v1672_v9 = vpop.f32.mrb[0].mxu0 }
  0xe0   :  { %v110_v11 = vpop.f32.mrb[1].mxu0  ;;  %v116_v13 = vadd.f32 %v1672_v9, %v1588_v8 }
  0xe1   :  { %v111_v12 = vadd.f32 %v1588_v8, %v110_v11 }
  0xe3   :  { %125 = vrot.lane.b32.xlu1 %v111_v12, %s1849_s10  ;;  %121 = vrot.lane.b32.xlu0 %v111_v12, %s1850_s11 }
  0xe7   :  { %127 = vrot.lane.b32.xlu1 %v116_v13, %s1849_s10  ;;  %123 = vrot.lane.b32.xlu0 %v116_v13, %s1850_s11  ;;  %s1855_s11 = smov 8  }
  0xeb   :  { %131 = vrot.lane.b32.xlu1 %v116_v13, %s1852_s0  ;;  %129 = vrot.lane.b32.xlu0 %v111_v12, %s1852_s0  ;;  %s1857_s0 = smov 24  }
  0xef   :  { %218 = vrot.lane.b32.xlu1 %v116_v13, %s1853_s3  ;;  %141 = vrot.lane.b32.xlu0 %v111_v12, %s1853_s3 }
 0x155   :  { %v126_v14 = vpop.permute.xlu1 %125  ;;  %v122_v15 = vpop.permute.xlu0 %121 }
 0x156   :  { %294 = vrot.lane.b32.xlu0 %v122_v15, %s1853_s3 }
 0x159   :  { %v124_v16 = vpop.permute.xlu0 %123  ;;  %v128_v17 = vpop.permute.xlu1 %127 }
 0x15a   :  { %446 = vrot.lane.b32.xlu0 %v126_v14, %s1853_s3  ;;  %370 = vrot.lane.b32.xlu1 %v124_v16, %s1853_s3 }
 0x15d   :  { %v1924_v18 = vpop.permute.xlu0 %129  ;;  %v1927_v19 = vpop.permute.xlu1 %131 }
 0x15e   :  { %522 = vrot.lane.b32.xlu1 %v128_v17, %s1853_s3  ;;  %598 = vrot.lane.b32.xlu0 %v1924_v18, %s1853_s3 }
 0x161   :  { %v142_v20 = vpop.permute.xlu0 %141  ;;  %v219_v21 = vpop.permute.xlu1 %218 }
 0x162   :  { %674 = vrot.lane.b32.xlu1 %v1927_v19, %s1853_s3  ;;  %898 = vrot.lane.b32.xlu0 %v116_v13, %s1854_s12 }
 0x163   :  { %1674 = vmatpush3.xpose.msk.msra.mxu1 %vm143_vm2, %v142_v20 }
 0x164   :  { %1678 = vmatprep.subr.mxu1 %v1848_v10 }
 0x166   :  { %1676 = vmatmul.mubr.msk.f32.vlgmr.msra.gmra.mrb[0].mxu1 %vm143_vm2, %v111_v12  ;;  %822 = vrot.lane.b32.xlu1 %v111_v12, %s1854_s12 }
 0x167   :  { %1126 = vrot.lane.b32.xlu0 %v126_v14, %s1854_s12  ;;  %1679 = vmatpush3.xpose.msk.msra.mxu1 %vm143_vm2, %v219_v21 }
 0x168   :  { %1680 = vmatprep.mubr.msk.f32.mxu1 %vm1851_vm1, %v1848_v10  ;;  %1683 = vmatprep.subr.mxu1 %v1848_v10 }
 0x16a   :  { %1681 = vmatmul.mubr.msk.f32.vlgmr.msra.gmra.mrb[2].mxu1 %vm143_vm2, %v116_v13  ;;  %1050 = vrot.lane.b32.xlu1 %v124_v16, %s1854_s12 }
 0x16b   :  { %1685 = vmatprep.mubr.msk.f32.mxu1 %vm1851_vm1, %v1848_v10 }
 0x16e   :  { %1202 = vrot.lane.b32.xlu1 %v128_v17, %s1854_s12 }
 0x172   :  { %974 = vrot.lane.b32.xlu1 %v122_v15, %s1854_s12 }
 0x1c8   :  { %v295_v22 = vpop.permute.xlu0 %294 }
 0x1c9   :  { %1684 = vmatpush3.xpose.msk.msra.mxu1 %vm143_vm2, %v295_v22 }
 0x1ca   :  { %1688 = vmatprep.subr.mxu1 %v1848_v10 }
 0x1cc   :  { %v371_v23 = vpop.permute.xlu1 %370  ;;  %1686 = vmatmul.mubr.msk.f32.vlgmr.msra.gmra.mrb[4].mxu1 %vm143_vm2, %v122_v15  ;;  %v447_v24 = vpop.permute.xlu0 %446 }
 0x1cd   :  { %1689 = vmatpush3.xpose.msk.msra.mxu1 %vm143_vm2, %v371_v23  ;;  %1694 = vmatpush3.xpose.msk.msra.mxu0 %vm143_vm2, %v447_v24 }
 0x1ce   :  { %1690 = vmatprep.mubr.msk.f32.mxu1 %vm1851_vm1, %v1848_v10  ;;  %1698 = vmatprep.subr.mxu1 %v1848_v10 }
 0x1cf   :  { %1703 = vmatprep.subr.mxu0 %v1848_v10 }
 0x1d0   :  { %v523_v25 = vpop.permute.xlu1 %522  ;;  %1691 = vmatmul.mubr.msk.f32.vlgmr.msra.gmra.mrb[6].mxu1 %vm143_vm2, %v124_v16  ;;  %1696 = vmatmul.mubr.msk.f32.vlgmr.msra.gmra.mrb[2].mxu0 %vm143_vm2, %v126_v14  ;;  %v599_v26 = vpop.permute.xlu0 %598 }
 0x1d1   :  { %1699 = vmatpush3.xpose.msk.msra.mxu1 %vm143_vm2, %v523_v25  ;;  %1704 = vmatpush3.xpose.msk.msra.mxu0 %vm143_vm2, %v599_v26 }
 0x1d2   :  { %1700 = vmatprep.mubr.msk.f32.mxu1 %vm1851_vm1, %v1848_v10  ;;  %1705 = vmatprep.mubr.msk.f32.mxu0 %vm1851_vm1, %v1848_v10 }
 0x1d3   :  { %1708 = vmatprep.subr.mxu1 %v1848_v10  ;;  %1713 = vmatprep.subr.mxu0 %v1848_v10 }
 0x1d4   :  { %v675_v27 = vpop.permute.xlu1 %674  ;;  %1701 = vmatmul.mubr.msk.f32.vlgmr.msra.gmra.mrb[8].mxu1 %vm143_vm2, %v128_v17  ;;  %1706 = vmatmul.mubr.msk.f32.vlgmr.msra.gmra.mrb[4].mxu0 %vm143_vm2, %v1924_v18  ;;  %v899_v28 = vpop.permute.xlu0 %898 }
 0x1d5   :  { %1709 = vmatpush3.xpose.msk.msra.mxu1 %vm143_vm2, %v675_v27  ;;  %1710 = vmatprep.mubr.msk.f32.mxu1 %vm1851_vm1, %v1848_v10 }
 0x1d6   :  { %1718 = vmatprep.subr.mxu1 %v1848_v10  ;;  %1715 = vmatprep.mubr.msk.f32.mxu0 %vm1851_vm1, %v1848_v10 }
 0x1d8   :  { %v823_v29 = vpop.permute.xlu1 %822  ;;  %1711 = vmatmul.mubr.msk.f32.vlgmr.msra.gmra.mrb[10].mxu1 %vm143_vm2, %v1927_v19 }
 0x1d9   :  { %1714 = vmatpush3.msra.mxu0 %v823_v29  ;;  %1719 = vmatpush3.msra.mxu1 %v899_v28  ;;  %v1127_v8 = vpop.permute.xlu0 %1126 }
 0x1da   :  { %1723 = vmatprep.subr.mxu0 %v1848_v10  ;;  %1720 = vmatprep.mubr.msk.f32.mxu1 %vm1851_vm1, %v1848_v10 }
 0x1db   :  { %1728 = vmatprep.subr.mxu1 %v1848_v10 }
 0x1dc   :  { %v1051_v6 = vpop.permute.xlu1 %1050 }
 0x1e0   :  { %v1203_v7 = vpop.permute.xlu1 %1202 }
 0x1e4   :  { %v975_v9 = vpop.permute.xlu1 %974 }
 0x239   :  { %v214_v31 = vpop.f32.mrb[0].mxu1 }
 0x23a   :  { %v215_v32 = vadd.f32 %v214_v31, %v133_v30  ;;  %v1677_v33 = vpop.f32.mrb[1].mxu1 }
 0x23c   :  { %v750_v35 = vsel %vm143_vm2, %v215_v32, -inf }
 0x23d   :  { %751 = vmax.xlane.f32.xlu0 %v750_v35  ;;  %v290_v36 = vpop.f32.mrb[2].mxu1 }
 0x23e   :  { %v291_v37 = vadd.f32 %v290_v36, %v134_v34  ;;  %v1682_v38 = vpop.f32.mrb[3].mxu1 }
 0x240   :  { %v753_v39 = vsel %vm143_vm2, %v291_v37, -inf }
 0x241   :  { %754 = vmax.xlane.f32.xlu1 %v753_v39 }
 0x29f   :  { %v366_v41 = vpop.f32.mrb[4].mxu1 }
 0x2a0   :  { %v367_v42 = vadd.f32 %v366_v41, %v135_v40  ;;  %v1687_v43 = vpop.f32.mrb[5].mxu1 }
 0x2a2   :  { %v756_v46 = vsel %vm143_vm2, %v367_v42, -inf }
 0x2a3   :  { %757 = vmax.xlane.f32.xlu0 %v756_v46  ;;  %v442_v47 = vpop.f32.mrb[6].mxu1  ;;  %v518_v48 = vpop.f32.mrb[2].mxu0 }
 0x2a4   :  { %v443_v49 = vadd.f32 %v442_v47, %v136_v44  ;;  %v519_v50 = vadd.f32 %v518_v48, %v137_v45  ;;  %v1692_v51 = vpop.f32.mrb[7].mxu1  ;;  %v1697_v52 = vpop.f32.mrb[3].mxu0 }
 0x2a6   :  { %v759_v55 = vsel %vm143_vm2, %v443_v49, -inf  ;;  %v762_v56 = vsel %vm143_vm2, %v519_v50, -inf }
 0x2a7   :  { %760 = vmax.xlane.f32.xlu0 %v759_v55  ;;  %v594_v57 = vpop.f32.mrb[8].mxu1  ;;  %763 = vmax.xlane.f32.xlu1 %v762_v56  ;;  %v670_v58 = vpop.f32.mrb[4].mxu0 }
 0x2a8   :  { %v595_v59 = vadd.f32 %v594_v57, %v138_v53  ;;  %v671_v60 = vadd.f32 %v670_v58, %v139_v54  ;;  %v1702_v61 = vpop.f32.mrb[9].mxu1  ;;  %v1707_v62 = vpop.f32.mrb[5].mxu0 }
 0x2a9   :  { %v1479_v61 = vld [vmem:[%s2102_s4 + $0x8] sm:$0xff] }
 0x2aa   :  { %v765_v0 = vsel %vm143_vm2, %v595_v59, -inf  ;;  %v768_v1 = vsel %vm143_vm2, %v671_v60, -inf }
 0x2ab   :  { %766 = vmax.xlane.f32.xlu0 %v765_v0  ;;  %v746_v2 = vpop.f32.mrb[10].mxu1  ;;  %769 = vmax.xlane.f32.xlu1 %v768_v1  ;;  %v1480_v0 = vld [vmem:[%s2102_s4 + $0x10] sm:$0xff]  ;;  %v1481_v1 = vld [vmem:[%s2102_s4 + $0x18] sm:$0xff] }
 0x2ac   :  { %v747_v3 = vadd.f32 %v746_v2, %v140_v63  ;;  %v1712_v4 = vpop.f32.mrb[11].mxu1  ;;  %v1776_v2 = vpack.c.bf16 %v1481_v1, %v1480_v0 }
 0x2ae   :  { %v771_v5 = vsel %vm143_vm2, %v747_v3, -inf }
 0x2af   :  { %772 = vmax.xlane.f32.xlu0 %v771_v5 }
 0x2bc   :  { %1354 = vrot.lane.b32.xlu1 %v1927_v19, %s1854_s12 }
 0x2c5   :  { %1278 = vrot.lane.b32.xlu0 %v1924_v18, %s1854_s12 }
 0x2ca   :  { %v752_v11 = vpop.xlane.xlu0 %751 }
 0x2cb   :  { %v774_v12 = vsub.f32 %v215_v32, %v752_v11 }
 0x2cd   :  { %v782_v13 = vmul.f32 1.442695, %v774_v12 }
 0x2ce   :  { %v755_v14 = vpop.xlane.xlu1 %754 }
 0x2cf   :  { %1792 = vpow2.f32 %v782_v13  ;;  %v775_v15 = vsub.f32 %v291_v37, %v755_v14 }
 0x2d1   :  { %v784_v16 = vmul.f32 1.442695, %v775_v15 }
 0x2d3   :  { %1794 = vpow2.f32 %v784_v16 }
 0x2d9   :  { %v2016_v17 = vpop.eup %1792 }
 0x2da   :  { %1716 = vmatmul.mubr.msk.f32.vlgmr.msra.gmra.mrb[6].mxu0 %vm143_vm2, %v2016_v17  ;;  %v798_v51 = vsel %vm143_vm2, %v2016_v17, 0.0 }
 0x2db   :  { %1724 = vmatpush3.msra.mxu0 %v975_v9  ;;  %1725 = vmatprep.mubr.msk.f32.mxu0 %vm1851_vm1, %v1848_v10 }
 0x2dc   :  { %1733 = vmatprep.subr.mxu0 %v1848_v10 }
 0x2dd   :  { %v2023_v18 = vpop.eup %1794 }
 0x2de   :  { %1721 = vmatmul.mubr.msk.f32.vlgmr.msra.gmra.mrb[12].mxu1 %vm143_vm2, %v2023_v18  ;;  %v801_v52 = vsel %vm143_vm2, %v2023_v18, 0.0 }
 0x2df   :  { %1729 = vmatpush3.msra.mxu1 %v1051_v6  ;;  %1730 = vmatprep.mubr.msk.f32.mxu1 %vm1851_vm1, %v1848_v10 }
 0x2e0   :  { %1738 = vmatprep.subr.mxu1 %v1848_v10 }
 0x330   :  { %v758_v19 = vpop.xlane.xlu0 %757 }
 0x331   :  { %v776_v20 = vsub.f32 %v367_v42, %v758_v19 }
 0x333   :  { %v786_v21 = vmul.f32 1.442695, %v776_v20 }
 0x334   :  { %v764_v22 = vpop.xlane.xlu1 %763  ;;  %v761_v23 = vpop.xlane.xlu0 %760 }
 0x335   :  { %1796 = vpow2.f32 %v786_v21  ;;  %v778_v24 = vsub.f32 %v519_v50, %v764_v22  ;;  %v777_v25 = vsub.f32 %v443_v49, %v761_v23 }
 0x337   :  { %v790_v26 = vmul.f32 1.442695, %v778_v24  ;;  %v788_v27 = vmul.f32 1.442695, %v777_v25 }
 0x338   :  { %v770_v28 = vpop.xlane.xlu1 %769  ;;  %v767_v29 = vpop.xlane.xlu0 %766 }
 0x339   :  { %1798 = vpow2.f32 %v790_v26  ;;  %v780_v30 = vsub.f32 %v671_v60, %v770_v28  ;;  %v779_v31 = vsub.f32 %v595_v59, %v767_v29  ;;  %v1478_v60 = vld [vmem:[%s2102_s4] sm:$0xff]  ;;  %s1856_s4 = smov 16  }
 0x33a   :  { %1800 = vpow2.f32 %v788_v27  ;;  %v1772_v62 = vpack.c.bf16 %v1479_v61, %v1478_v60 }
 0x33b   :  { %v794_v32 = vmul.f32 1.442695, %v780_v30  ;;  %v792_v33 = vmul.f32 1.442695, %v779_v31 }
 0x33c   :  { %v773_v34 = vpop.xlane.xlu0 %772  ;;  %v1355_v47 = vpop.permute.xlu1 %1354 }
 0x33d   :  { %1802 = vpow2.f32 %v794_v32  ;;  %v781_v35 = vsub.f32 %v747_v3, %v773_v34 }
 0x33e   :  { %1804 = vpow2.f32 %v792_v33 }
 0x33f   :  { %v1797_v36 = vpop.eup %1796  ;;  %v796_v37 = vmul.f32 1.442695, %v781_v35 }
 0x340   :  { %1726 = vmatmul.mubr.msk.f32.vlgmr.msra.gmra.mrb[8].mxu0 %vm143_vm2, %v1797_v36  ;;  %v804_v38 = vsel %vm143_vm2, %v1797_v36, 0.0  ;;  %v1279_v41 = vpop.permute.xlu0 %1278 }
 0x341   :  { %1806 = vpow2.f32 %v796_v37  ;;  %1734 = vmatpush3.msra.mxu0 %v1127_v8  ;;  %805 = vadd.xlane.f32.xlu0 %v804_v38 }
 0x342   :  { %1735 = vmatprep.mubr.msk.f32.mxu0 %vm1851_vm1, %v1848_v10  ;;  %1743 = vmatprep.subr.mxu0 %v1848_v10 }
 0x343   :  { %v1799_v39 = vpop.eup %1798 }
 0x344   :  { %v1801_v40 = vpop.eup %1800  ;;  %1736 = vmatmul.mubr.msk.f32.vlgmr.msra.gmra.mrb[10].mxu0 %vm143_vm2, %v1799_v39  ;;  %v810_v42 = vsel %vm143_vm2, %v1799_v39, 0.0 }
 0x345   :  { %1731 = vmatmul.mubr.msk.f32.vlgmr.msra.gmra.mrb[14].mxu1 %vm143_vm2, %v1801_v40  ;;  %1744 = vmatpush3.msra.mxu0 %v1279_v41  ;;  %v807_v43 = vsel %vm143_vm2, %v1801_v40, 0.0 }
 0x346   :  { %1739 = vmatpush3.msra.mxu1 %v1203_v7  ;;  %811 = vadd.xlane.f32.xlu0 %v810_v42 }
 0x347   :  { %v1803_v44 = vpop.eup %1802  ;;  %808 = vadd.xlane.f32.xlu1 %v807_v43  ;;  %1740 = vmatprep.mubr.msk.f32.mxu1 %vm1851_vm1, %v1848_v10 }
 0x348   :  { %v1805_v45 = vpop.eup %1804  ;;  %1745 = vmatprep.mubr.msk.f32.mxu0 %vm1851_vm1, %v1848_v10  ;;  %1748 = vmatprep.subr.mxu1 %v1848_v10  ;;  %v816_v46 = vsel %vm143_vm2, %v1803_v44, 0.0 }
 0x349   :  { %1741 = vmatmul.mubr.msk.f32.vlgmr.msra.gmra.mrb[16].mxu1 %vm143_vm2, %v1805_v45  ;;  %1746 = vmatmul.mubr.msk.f32.vlgmr.msra.gmra.mrb[12].mxu0 %vm143_vm2, %v1803_v44  ;;  %v813_v48 = vsel %vm143_vm2, %v1805_v45, 0.0 }
 0x34a   :  { %1749 = vmatpush3.msra.mxu1 %v1355_v47  ;;  %814 = vadd.xlane.f32.xlu0 %v813_v48  ;;  %v1615_v47 = vld [vmem:[%s2103_s5] ss:$0 sm:$0xff] }
 0x34b   :  { %v1807_v49 = vpop.eup %1806  ;;  %817 = vadd.xlane.f32.xlu1 %v816_v46  ;;  %1750 = vmatprep.mubr.msk.f32.mxu1 %vm1851_vm1, %v1848_v10 }
 0x34c   :  { %v819_v50 = vsel %vm143_vm2, %v1807_v49, 0.0  ;;  %1773 = vmatprep.subr.bf16.mxu0 %v1772_v62 }
 0x34d   :  { %1751 = vmatmul.mubr.msk.f32.vlgmr.msra.gmra.mrb[18].mxu1 %vm143_vm2, %v1807_v49  ;;  %1775 = vmatpush3.bf16.msra.mxu0 %v1772_v62 }
 0x34e   :  { %820 = vadd.xlane.f32.xlu0 %v819_v50  ;;  %1777 = vmatprep.subr.bf16.mxu0 %v1776_v2 }
 0x34f   :  { %799 = vadd.xlane.f32.xlu1 %v798_v51 }
 0x351   :  { %1779 = vmatpush3.bf16.msra.mxu0 %v1776_v2 }
 0x352   :  { %802 = vadd.xlane.f32.xlu0 %v801_v52 }
 0x3ad   :  { %v2056_v53 = vpop.f32.mrb[6].mxu0 }
 0x3ae   :  { %v1717_v54 = vpop.f32.mrb[7].mxu0 }
 0x3b1   :  { %v2058_v55 = vpop.f32.mrb[12].mxu1 }
 0x3b2   :  { %v1722_v56 = vpop.f32.mrb[13].mxu1 }
 0x3ce   :  { %v806_v10 = vpop.xlane.xlu0 %805 }
 0x3cf   :  { %1808 = vrcp.f32 %v806_v10 }
 0x3d3   :  { %v812_v57 = vpop.xlane.xlu0 %811 }
 0x3d4   :  { %v809_v58 = vpop.xlane.xlu1 %808  ;;  %1810 = vrcp.f32 %v812_v57 }
 0x3d5   :  { %1812 = vrcp.f32 %v809_v58 }
 0x3d7   :  { %v815_v59 = vpop.xlane.xlu0 %814 }
 0x3d8   :  { %v818_v63 = vpop.xlane.xlu1 %817  ;;  %1814 = vrcp.f32 %v815_v59 }
 0x3d9   :  { %1816 = vrcp.f32 %v818_v63  ;;  %v1809_v3 = vpop.eup %1808 }
 0x3db   :  { %v821_v4 = vpop.xlane.xlu0 %820 }
 0x3dc   :  { %1818 = vrcp.f32 %v821_v4  ;;  %v800_v29 = vpop.xlane.xlu1 %799 }
 0x3dd   :  { %1820 = vrcp.f32 %v800_v29 }
 0x3de   :  { %v1811_v8 = vpop.eup %1810 }
 0x3df   :  { %v1813_v11 = vpop.eup %1812  ;;  %v803_v30 = vpop.xlane.xlu0 %802 }
 0x3e0   :  { %1822 = vrcp.f32 %v803_v30 }
 0x3e2   :  { %v1815_v17 = vpop.eup %1814 }
 0x3e3   :  { %v1817_v18 = vpop.eup %1816 }
 0x3e6   :  { %v1819_v25 = vpop.eup %1818 }
 0x3e7   :  { %v1821_v32 = vpop.eup %1820 }
 0x3e8   :  { %v1438_v35 = vmul.f32 %v1821_v32, %v2056_v53 }
 0x3ea   :  { %v1823_v36 = vpop.eup %1822 }
 0x3eb   :  { %v1439_v41 = vmul.f32 %v1823_v36, %v2058_v55 }
 0x413   :  { %v1046_v5 = vpop.f32.mrb[8].mxu0 }
 0x414   :  { %v1440_v6 = vmul.f32 %v1809_v3, %v1046_v5  ;;  %v1727_v7 = vpop.f32.mrb[9].mxu0 }
 0x416   :  { %1448 = vrot.lane.b32.xlu1 %v1440_v6, %s1855_s11 }
 0x417   :  { %v1198_v9 = vpop.f32.mrb[10].mxu0 }
 0x418   :  { %v1122_v12 = vpop.f32.mrb[14].mxu1  ;;  %v1442_v13 = vmul.f32 %v1811_v8, %v1198_v9  ;;  %v1737_v14 = vpop.f32.mrb[11].mxu0 }
 0x419   :  { %v1441_v15 = vmul.f32 %v1813_v11, %v1122_v12  ;;  %v1732_v16 = vpop.f32.mrb[15].mxu1 }
 0x41a   :  { %1456 = vrot.lane.b32.xlu1 %v1442_v13, %s1856_s4 }
 0x41b   :  { %1450 = vrot.lane.b32.xlu0 %v1441_v15, %s1855_s11 }
 0x41c   :  { %v1274_v19 = vpop.f32.mrb[16].mxu1  ;;  %v1350_v20 = vpop.f32.mrb[12].mxu0 }
 0x41d   :  { %v1443_v21 = vmul.f32 %v1815_v17, %v1274_v19  ;;  %v1444_v22 = vmul.f32 %v1817_v18, %v1350_v20  ;;  %v1742_v23 = vpop.f32.mrb[17].mxu1  ;;  %v1747_v24 = vpop.f32.mrb[13].mxu0 }
 0x41f   :  { %1464 = vrot.lane.b32.xlu0 %v1444_v22, %s1857_s0  ;;  %1458 = vrot.lane.b32.xlu1 %v1443_v21, %s1856_s4 }
 0x420   :  { %v1426_v26 = vpop.f32.mrb[18].mxu1 }
 0x421   :  { %v1445_v27 = vmul.f32 %v1819_v25, %v1426_v26  ;;  %v1752_v28 = vpop.f32.mrb[19].mxu1 }
 0x423   :  { %1466 = vrot.lane.b32.xlu1 %v1445_v27, %s1857_s0 }
 0x488   :  { %v1449_v31 = vpop.permute.xlu1 %1448 }
 0x489   :  { %v1470_v37 = vsel %vm143_vm2, %v1438_v35, %v1449_v31 }
 0x48c   :  { %v1457_v33 = vpop.permute.xlu1 %1456 }
 0x48d   :  { %v1451_v34 = vpop.permute.xlu0 %1450  ;;  %v1473_v38 = vsel %vm1472_vm3, %v1470_v37, %v1457_v33 }
 0x48e   :  { %v1471_v43 = vsel %vm143_vm2, %v1439_v41, %v1451_v34 }
 0x491   :  { %v1459_v39 = vpop.permute.xlu1 %1458  ;;  %v1465_v40 = vpop.permute.xlu0 %1464 }
 0x492   :  { %v1476_v42 = vsel %vm1475_vm4, %v1473_v38, %v1465_v40  ;;  %v1474_v44 = vsel %vm1472_vm3, %v1471_v43, %v1459_v39 }
 0x493   :  { %1761 = vmatprep.mubr.msk.f32.mxu0 %vm37_vm0, %v1476_v42 }
 0x495   :  { %v1467_v45 = vpop.permute.xlu1 %1466 }
 0x496   :  { %v1477_v46 = vsel %vm1475_vm4, %v1474_v44, %v1467_v45 }
 0x497   :  { %1762 = vmatmul.mubr.msk.f32.vlgmr.msra.gmra.mrb[14].mxu0 %vm37_vm0, %v1477_v46 }
 0x56a   :  { %v1763_v48 = vpop.f32.mrb[14].mxu0 }
 0x56b   :  { %v1567_v49 = vadd.f32 %v1763_v48, %v1615_v47  ;;  %v1561_v50 = vpop.f32.mrb[15].mxu0 }
 0x56c   :  { %v1562_v51 = vadd.f32 %v1615_v47, %v1561_v50 }
 0x56d   :  { %1571 = vst.msk [vmem:[#allocation2 + $0x8] sm:$0xff] %vm37_vm0, %v1567_v49 }
 0x56e   :  { %1570 = vst.msk [vmem:[#allocation2] sm:$0xff] %vm37_vm0, %v1562_v51 }
 0x56f   :  { %1835 = shalt.err (!%p1832_p4)
}
 0x570   :  { %s1836_s17 = scalar_lea.hbm %s2104_s6, 256 }
 0x571   :  { %p1837_p5 = scmp.ne.s32.totalorder %s2104_s6, %s1836_s17  ;;  %p1840_p6 = scmp.lt.u32.totalorder %s1836_s17, %s2104_s6 }
 0x573   :  { %p1842_p7 = pnand %p1840_p6, %p1837_p5 }
 0x575   :  { %1845 = shalt.err (!%p1842_p7)
}
 0x576   :  { %s1859_s22 = smov 128  }
 0x577   :  { %1583 = dma.vmem_to_hbm [thread:$0]  %s1578_s14, 256, %s2104_s6, [#allocation3], %s1859_s22, %s1859_s22, %s1855_s11  }
 0x578   :  { %1846 = dma.done.wait [#allocation3], 256  }
 0x579   :  { %1847 = vsyncadd [#allocation3], 4294967040 }
 0x57a   :  { %1587 = vsyncpa [#allocation3], 1 }

</bundles_post_ra>
